<compile_context>
chip_gen: v6e
topology: v6e:2x2x1
jax: 0.10.0
libtpu: 0.0.40
codegen_flags: <defaults>
</compile_context>

<pallas_src>
import functools

import jax
import jax.numpy as jnp
from jax.experimental import pallas as pl
from jax.experimental.pallas import tpu as pltpu


def _attention_pooling_kernel(x_ref, w_ref, acc_ref, m_ref, l_ref, scores_ref,
                              *, seq_len, tile_rows, tiles_per_split, needs_padding):
    # x_ref:      (tile_rows, H)     current sequence tile            (VMEM in, streamed)
    # w_ref:      (1, H)             attention weight row             (VMEM in, resident)
    # acc_ref:    (1, 1, H)   f32    per-split rescaled weighted sum  (VMEM out, resident)
    # m_ref:      (1, 1, 1)   f32    per-split running max            (VMEM out, resident)
    # l_ref:      (1, 1, 1)   f32    per-split softmax denominator    (VMEM out, resident)
    # scores_ref: (1, 1, tile_rows)  raw scores for this tile         (VMEM out, streamed)
    c = pl.program_id(0)
    k = pl.program_id(1)
    tile_start = (c * tiles_per_split + k) * tile_rows

    @pl.when(k == 0)
    def _init():
        m_ref[...] = jnp.full(m_ref.shape, -jnp.inf, dtype=m_ref.dtype)
        l_ref[...] = jnp.zeros(l_ref.shape, dtype=l_ref.dtype)
        acc_ref[...] = jnp.zeros(acc_ref.shape, dtype=acc_ref.dtype)

    if needs_padding:
        # Only the boundary / fully-padded tiles pay for the row masking: zero the padded
        # rows of the VMEM block in place so stale-VMEM NaN/Inf garbage cannot poison the
        # 0 * x terms of the weighted-sum matmul.
        @pl.when(tile_start + tile_rows > seq_len)
        def _zero_padded_rows():
            row_ids = jax.lax.broadcasted_iota(jnp.int32, x_ref.shape, 0) + tile_start
            x_ref[...] = jnp.where(row_ids < seq_len, x_ref[...],
                                   jnp.zeros(x_ref.shape, x_ref.dtype))

    # Lane-dense scores: (1, tile_rows) row via an M=1 matmul on the otherwise idle MXU.
    s_row = jax.lax.dot_general(
        w_ref[...], x_ref[...], (((1,), (1,)), ((), ())),
        preferred_element_type=jnp.float32)                         # (1, tile_rows)
    if needs_padding:
        lane_ids = jax.lax.broadcasted_iota(jnp.int32, s_row.shape, 1) + tile_start
        s_row = jnp.where(lane_ids < seq_len, s_row, -jnp.inf)

    scores_ref[0] = s_row          # stream raw scores; normalised in the XLA epilogue

    # Online softmax update for this split.
    m_prev = m_ref[0]                                               # (1, 1)
    m_new = jnp.maximum(m_prev, jnp.max(s_row, axis=1, keepdims=True))
    alpha = jnp.exp(m_prev - m_new)                                 # exp(-inf) = 0 at k == 0
    p_row = jnp.exp(s_row - m_new)                                  # zero on padded lanes
    l_ref[0] = alpha * l_ref[0] + jnp.sum(p_row, axis=1, keepdims=True)
    acc_ref[0] = alpha * acc_ref[0] + jax.lax.dot_general(
        p_row.astype(x_ref.dtype), x_ref[...], (((1,), (0,)), ((), ())),
        preferred_element_type=jnp.float32)                         # (1, H)
    m_ref[0] = m_new


def _round_up(n, m):
    return ((n + m - 1) // m) * m


def _sublane(itemsize):
    # Native sublane tile: 8 rows f32, 16 rows bf16, 32 rows int8/fp8.
    return 8 * max(1, 4 // itemsize)


def _default_tile_rows(seq_len, hidden, itemsize, block_bytes):
    sub = _sublane(itemsize)
    rows = max(1, block_bytes // max(hidden * itemsize, 1))
    if rows >= 128:
        rows = (rows // 128) * 128      # lane-dense streamed score rows
    rows = max(sub, (rows // sub) * sub)
    return min(rows, _round_up(seq_len, sub))


def attention_pooling(x, attention_weight, *, tile_rows=None, num_splits=None,
                      x_block_bytes=8 * 1024 * 1024,
                      vmem_limit_bytes=48 * 1024 * 1024):
    """x: (S, H) float32/bfloat16, attention_weight: (H, 1).

    Returns (weighted_sum (H,) in x.dtype, attention_probs (S,) float32),
    matching the PyTorch AttentionPooling forward.
    """
    S, H = x.shape
    assert attention_weight.shape == (H, 1)
    itemsize = jnp.dtype(x.dtype).itemsize
    sub = _sublane(itemsize)

    if tile_rows is None:
        tile_rows = _default_tile_rows(S, H, itemsize, x_block_bytes)
    else:
        tile_rows = max(sub, (int(tile_rows) // sub) * sub)
        tile_rows = min(tile_rows, _round_up(S, sub))

    num_tiles = -(-S // tile_rows)
    if num_splits is None:
        num_splits = 2 if num_tiles >= 2 else 1   # v7x: one sequence half per TensorCore
    num_splits = max(1, min(int(num_splits), num_tiles))
    tiles_per_split = -(-num_tiles // num_splits)
    total_tiles = num_splits * tiles_per_split
    needs_padding = (total_tiles * tile_rows) != S
    last_x_block = num_tiles - 1

    w_row = attention_weight.reshape(1, H).astype(x.dtype)

    kernel = functools.partial(
        _attention_pooling_kernel,
        seq_len=S, tile_rows=tile_rows, tiles_per_split=tiles_per_split,
        needs_padding=needs_padding)

    def x_map(c, k):
        # Clamp fully out-of-range padding blocks onto the last valid block; their
        # contribution is masked to exactly zero inside the kernel.
        return (jnp.minimum(c * tiles_per_split + k, last_x_block), 0)

    acc, m, l, scores = pl.pallas_call(
        kernel,
        out_shape=(
            jax.ShapeDtypeStruct((num_splits, 1, H), jnp.float32),          # per-split acc
            jax.ShapeDtypeStruct((num_splits, 1, 1), jnp.float32),          # per-split max
            jax.ShapeDtypeStruct((num_splits, 1, 1), jnp.float32),          # per-split denom
            jax.ShapeDtypeStruct((total_tiles, 1, tile_rows), jnp.float32),  # raw scores
        ),
        grid_spec=pltpu.PrefetchScalarGridSpec(
            num_scalar_prefetch=0,
            grid=(num_splits, tiles_per_split),
            in_specs=[
                pl.BlockSpec((tile_rows, H), x_map),                 # stream x exactly once
                pl.BlockSpec((1, H), lambda c, k: (0, 0)),           # weight row, resident
            ],
            out_specs=[
                pl.BlockSpec((1, 1, H), lambda c, k: (c, 0, 0)),     # resident accumulator
                pl.BlockSpec((1, 1, 1), lambda c, k: (c, 0, 0)),     # resident running max
                pl.BlockSpec((1, 1, 1), lambda c, k: (c, 0, 0)),     # resident denominator
                pl.BlockSpec((1, 1, tile_rows),
                             lambda c, k: (c * tiles_per_split + k, 0, 0)),  # streamed scores
            ],
        ),
        compiler_params=pltpu.CompilerParams(
            dimension_semantics=("parallel", "arbitrary"),
            vmem_limit_bytes=vmem_limit_bytes,
        ),
    )(x, w_row)

    # Tiny XLA epilogue: flash-style merge of the per-split partials + probs normalise.
    m_global = jnp.max(m)                                    # scalar
    alpha = jnp.exp(m - m_global)                            # (num_splits, 1, 1)
    l_global = jnp.sum(l * alpha)                            # scalar
    wsum = (jnp.sum(acc * alpha, axis=(0, 1)) / l_global).astype(x.dtype)   # (H,)
    probs = jnp.exp(scores.reshape(-1)[:S] - m_global) / l_global           # (S,) f32
    return wsum, probs


def _reference(x, attention_weight):
    # Exact f32 reference (elementwise multiply + reduce, no MXU precision ambiguity).
    w = attention_weight.reshape(-1).astype(jnp.float32)
    scores = jnp.sum(x.astype(jnp.float32) * w[None, :], axis=1)
    probs = jax.nn.softmax(scores, axis=0)
    wsum = (x.astype(jnp.float32) * probs[:, None]).sum(axis=0).astype(x.dtype)
    return wsum, probs


if __name__ == "__main__":
    key = jax.random.PRNGKey(0)
    kx, kw, kx2 = jax.random.split(key, 3)

    # Small shapes consistent with the module: seq=8, hidden=32 (single tile, no split).
    S, H = 8, 32
    x = jax.random.normal(kx, (S, H), dtype=jnp.float32)
    attention_weight = jax.random.normal(kw, (H, 1), dtype=jnp.float32)

    wsum, probs = attention_pooling(x, attention_weight)
    jax.block_until_ready((wsum, probs))

    ref_wsum, ref_probs = _reference(x, attention_weight)
    assert wsum.shape == (H,) and probs.shape == (S,)
    assert jnp.allclose(wsum, ref_wsum, atol=1e-4, rtol=1e-4)
    assert jnp.allclose(probs, ref_probs, atol=1e-5, rtol=1e-4)

    # Multi-tile + ragged last tile + 2-way split: exercises the streaming online-softmax
    # path, the padded-block masking and the per-split flash-style combine.
    S2 = 40
    x2 = jax.random.normal(kx2, (S2, H), dtype=jnp.float32)
    wsum2, probs2 = attention_pooling(x2, attention_weight, tile_rows=16)
    jax.block_until_ready((wsum2, probs2))

    ref_wsum2, ref_probs2 = _reference(x2, attention_weight)
    assert wsum2.shape == (H,) and probs2.shape == (S2,)
    assert jnp.allclose(wsum2, ref_wsum2, atol=1e-4, rtol=1e-4)
    assert jnp.allclose(probs2, ref_probs2, atol=1e-5, rtol=1e-4)

    print("KERNEL_OK")
</pallas_src>

<mosaic_0001>
module attributes {stable_mosaic.version = 11 : i64} {
  func.func @_attention_pooling_kernel(%arg0: i32, %arg1: i32, %arg2: memref<8x32xf32, #tpu.memory_space<vmem>>, %arg3: memref<1x32xf32, #tpu.memory_space<vmem>>, %arg4: memref<1x1x32xf32, #tpu.memory_space<vmem>>, %arg5: memref<1x1x1xf32, #tpu.memory_space<vmem>>, %arg6: memref<1x1x1xf32, #tpu.memory_space<vmem>>, %arg7: memref<1x1x8xf32, #tpu.memory_space<vmem>>) attributes {dimension_semantics = [#tpu.dimension_semantics<parallel>, #tpu.dimension_semantics<arbitrary>], iteration_bounds = array<i64: 1, 1>, scalar_prefetch = 0 : i64, scratch_operands = 0 : i64, tpu.core_type = #tpu.core_type<tc>, window_params = [{transform_indices = @transform_0, window_bounds = array<i64: 8, 32>}, {pipeline_mode = #tpu.pipeline_mode<synchronous>, transform_indices = @transform_1, window_bounds = array<i64: 1, 32>}, {transform_indices = @transform_2, window_bounds = array<i64: 1, 1, 32>}, {transform_indices = @transform_3, window_bounds = array<i64: 1, 1, 1>}, {transform_indices = @transform_4, window_bounds = array<i64: 1, 1, 1>}, {transform_indices = @transform_5, window_bounds = array<i64: 1, 1, 8>}]} {
    %c0_i32 = arith.constant 0 : i32
    %0 = arith.cmpi eq, %arg1, %c0_i32 : i32
    %1 = arith.extui %0 : i1 to i32
    %c0_i32_0 = arith.constant 0 : i32
    %2 = arith.cmpi ne, %1, %c0_i32_0 : i32
    scf.if %2 {
      %cst_30 = arith.constant 0xFF800000 : f32
      %41 = vector.broadcast %cst_30 : f32 to vector<1x1x1xf32>
      %c0_31 = arith.constant 0 : index
      %c0_32 = arith.constant 0 : index
      %c0_33 = arith.constant 0 : index
      %42 = vector.load %arg5[%c0_31, %c0_32, %c0_33] : memref<1x1x1xf32, #tpu.memory_space<vmem>>, vector<1x1x1xf32>
      tpu.vector_store %arg5[%c0_31, %c0_32, %c0_33], %41 {strides = array<i32>} : memref<1x1x1xf32, #tpu.memory_space<vmem>>, vector<1x1x1xf32>,
      %cst_34 = arith.constant 0.000000e+00 : f32
      %43 = vector.broadcast %cst_34 : f32 to vector<1x1x1xf32>
      %c0_35 = arith.constant 0 : index
      %c0_36 = arith.constant 0 : index
      %c0_37 = arith.constant 0 : index
      %44 = vector.load %arg6[%c0_35, %c0_36, %c0_37] : memref<1x1x1xf32, #tpu.memory_space<vmem>>, vector<1x1x1xf32>
      tpu.vector_store %arg6[%c0_35, %c0_36, %c0_37], %43 {strides = array<i32>} : memref<1x1x1xf32, #tpu.memory_space<vmem>>, vector<1x1x1xf32>,
      %cst_38 = arith.constant 0.000000e+00 : f32
      %45 = vector.broadcast %cst_38 : f32 to vector<1x1x32xf32>
      %c0_39 = arith.constant 0 : index
      %c0_40 = arith.constant 0 : index
      %c0_41 = arith.constant 0 : index
      %46 = vector.load %arg4[%c0_39, %c0_40, %c0_41] : memref<1x1x32xf32, #tpu.memory_space<vmem>>, vector<1x1x32xf32>
      tpu.vector_store %arg4[%c0_39, %c0_40, %c0_41], %45 {strides = array<i32>} : memref<1x1x32xf32, #tpu.memory_space<vmem>>, vector<1x1x32xf32>,
    } else {
    }
    %c0 = arith.constant 0 : index
    %c0_1 = arith.constant 0 : index
    %3 = vector.load %arg3[%c0, %c0_1] : memref<1x32xf32, #tpu.memory_space<vmem>>, vector<1x32xf32>
    %c0_2 = arith.constant 0 : index
    %c0_3 = arith.constant 0 : index
    %4 = vector.load %arg2[%c0_2, %c0_3] : memref<8x32xf32, #tpu.memory_space<vmem>>, vector<8x32xf32>
    %cst = arith.constant dense<0.000000e+00> : vector<1x8xf32>
    %5 = tpu.matmul %3, %4, %cst {dimension_numbers = #tpu.dot_dimension_numbers<[1], [1], [0], [0], [0, 0, 1, 0], [], []>} : vector<1x32xf32>, vector<8x32xf32>, vector<1x8xf32> -> vector<1x8xf32>
    %c0_4 = arith.constant 0 : index
    %c0_5 = arith.constant 0 : index
    %c0_6 = arith.constant 0 : index
    %6 = vector.load %arg7[%c0_4, %c0_5, %c0_6] : memref<1x1x8xf32, #tpu.memory_space<vmem>>, vector<1x1x8xf32>
    %7 = vector.shape_cast %6 : vector<1x1x8xf32> to vector<1x8xf32>
    %8 = vector.shape_cast %5 : vector<1x8xf32> to vector<1x1x8xf32>
    tpu.vector_store %arg7[%c0_4, %c0_5, %c0_6], %8 {strides = array<i32>} : memref<1x1x8xf32, #tpu.memory_space<vmem>>, vector<1x1x8xf32>,
    %c0_7 = arith.constant 0 : index
    %c0_8 = arith.constant 0 : index
    %c0_9 = arith.constant 0 : index
    %9 = vector.load %arg5[%c0_7, %c0_8, %c0_9] : memref<1x1x1xf32, #tpu.memory_space<vmem>>, vector<1x1x1xf32>
    %10 = vector.shape_cast %9 : vector<1x1x1xf32> to vector<1x1xf32>
    %cst_10 = arith.constant dense<0xFF800000> : vector<1xf32>
    %11 = vector.multi_reduction <maximumf>, %5, %cst_10 [1] : vector<1x8xf32> to vector<1xf32>
    %12 = vector.shape_cast %11 : vector<1xf32> to vector<1x1xf32>
    %13 = arith.maximumf %10, %12 : vector<1x1xf32>
    %14 = arith.subf %10, %13 : vector<1x1xf32>
    %15 = math.exp %14 : vector<1x1xf32>
    %16 = vector.broadcast %13 : vector<1x1xf32> to vector<1x8xf32>
    %17 = arith.subf %5, %16 : vector<1x8xf32>
    %18 = math.exp %17 : vector<1x8xf32>
    %c0_11 = arith.constant 0 : index
    %c0_12 = arith.constant 0 : index
    %c0_13 = arith.constant 0 : index
    %19 = vector.load %arg6[%c0_11, %c0_12, %c0_13] : memref<1x1x1xf32, #tpu.memory_space<vmem>>, vector<1x1x1xf32>
    %20 = vector.shape_cast %19 : vector<1x1x1xf32> to vector<1x1xf32>
    %21 = arith.mulf %15, %20 : vector<1x1xf32>
    %cst_14 = arith.constant dense<0.000000e+00> : vector<1xf32>
    %22 = vector.multi_reduction <add>, %18, %cst_14 [1] : vector<1x8xf32> to vector<1xf32>
    %23 = vector.shape_cast %22 : vector<1xf32> to vector<1x1xf32>
    %24 = arith.addf %21, %23 : vector<1x1xf32>
    %c0_15 = arith.constant 0 : index
    %c0_16 = arith.constant 0 : index
    %c0_17 = arith.constant 0 : index
    %25 = vector.load %arg6[%c0_15, %c0_16, %c0_17] : memref<1x1x1xf32, #tpu.memory_space<vmem>>, vector<1x1x1xf32>
    %26 = vector.shape_cast %25 : vector<1x1x1xf32> to vector<1x1xf32>
    %27 = vector.shape_cast %24 : vector<1x1xf32> to vector<1x1x1xf32>
    tpu.vector_store %arg6[%c0_15, %c0_16, %c0_17], %27 {strides = array<i32>} : memref<1x1x1xf32, #tpu.memory_space<vmem>>, vector<1x1x1xf32>,
    %c0_18 = arith.constant 0 : index
    %c0_19 = arith.constant 0 : index
    %c0_20 = arith.constant 0 : index
    %28 = vector.load %arg4[%c0_18, %c0_19, %c0_20] : memref<1x1x32xf32, #tpu.memory_space<vmem>>, vector<1x1x32xf32>
    %29 = vector.shape_cast %28 : vector<1x1x32xf32> to vector<1x32xf32>
    %30 = vector.broadcast %15 : vector<1x1xf32> to vector<1x32xf32>
    %31 = arith.mulf %30, %29 : vector<1x32xf32>
    %c0_21 = arith.constant 0 : index
    %c0_22 = arith.constant 0 : index
    %32 = vector.load %arg2[%c0_21, %c0_22] : memref<8x32xf32, #tpu.memory_space<vmem>>, vector<8x32xf32>
    %cst_23 = arith.constant dense<0.000000e+00> : vector<1x32xf32>
    %33 = tpu.matmul %18, %32, %cst_23 {dimension_numbers = #tpu.dot_dimension_numbers<[1], [0], [0], [1], [0, 0, 1, 1], [], []>} : vector<1x8xf32>, vector<8x32xf32>, vector<1x32xf32> -> vector<1x32xf32>
    %34 = arith.addf %31, %33 : vector<1x32xf32>
    %c0_24 = arith.constant 0 : index
    %c0_25 = arith.constant 0 : index
    %c0_26 = arith.constant 0 : index
    %35 = vector.load %arg4[%c0_24, %c0_25, %c0_26] : memref<1x1x32xf32, #tpu.memory_space<vmem>>, vector<1x1x32xf32>
    %36 = vector.shape_cast %35 : vector<1x1x32xf32> to vector<1x32xf32>
    %37 = vector.shape_cast %34 : vector<1x32xf32> to vector<1x1x32xf32>
    tpu.vector_store %arg4[%c0_24, %c0_25, %c0_26], %37 {strides = array<i32>} : memref<1x1x32xf32, #tpu.memory_space<vmem>>, vector<1x1x32xf32>,
    %c0_27 = arith.constant 0 : index
    %c0_28 = arith.constant 0 : index
    %c0_29 = arith.constant 0 : index
    %38 = vector.load %arg5[%c0_27, %c0_28, %c0_29] : memref<1x1x1xf32, #tpu.memory_space<vmem>>, vector<1x1x1xf32>
    %39 = vector.shape_cast %38 : vector<1x1x1xf32> to vector<1x1xf32>
    %40 = vector.shape_cast %13 : vector<1x1xf32> to vector<1x1x1xf32>
    tpu.vector_store %arg5[%c0_27, %c0_28, %c0_29], %40 {strides = array<i32>} : memref<1x1x1xf32, #tpu.memory_space<vmem>>, vector<1x1x1xf32>,
    return
  }
  func.func @transform_0(%arg0: i32, %arg1: i32) -> (i32, i32) {
    %c1_i32 = arith.constant 1 : i32
    %0 = arith.muli %arg0, %c1_i32 : i32
    %1 = arith.addi %0, %arg1 : i32
    %c0_i32 = arith.constant 0 : i32
    %2 = arith.minsi %1, %c0_i32 : i32
    %c0_i32_0 = arith.constant 0 : i32
    %c0_i32_1 = arith.constant 0 : i32
    return %2, %c0_i32_0 : i32, i32
  }
  func.func @transform_1(%arg0: i32, %arg1: i32) -> (i32, i32) {
    %c0_i32 = arith.constant 0 : i32
    %c0_i32_0 = arith.constant 0 : i32
    %c0_i32_1 = arith.constant 0 : i32
    return %c0_i32, %c0_i32_0 : i32, i32
  }
  func.func @transform_2(%arg0: i32, %arg1: i32) -> (i32, i32, i32) {
    %c0_i32 = arith.constant 0 : i32
    %c0_i32_0 = arith.constant 0 : i32
    %c0_i32_1 = arith.constant 0 : i32
    return %arg0, %c0_i32, %c0_i32_0 : i32, i32, i32
  }
  func.func @transform_3(%arg0: i32, %arg1: i32) -> (i32, i32, i32) {
    %c0_i32 = arith.constant 0 : i32
    %c0_i32_0 = arith.constant 0 : i32
    %c0_i32_1 = arith.constant 0 : i32
    return %arg0, %c0_i32, %c0_i32_0 : i32, i32, i32
  }
  func.func @transform_4(%arg0: i32, %arg1: i32) -> (i32, i32, i32) {
    %c0_i32 = arith.constant 0 : i32
    %c0_i32_0 = arith.constant 0 : i32
    %c0_i32_1 = arith.constant 0 : i32
    return %arg0, %c0_i32, %c0_i32_0 : i32, i32, i32
  }
  func.func @transform_5(%arg0: i32, %arg1: i32) -> (i32, i32, i32) {
    %c1_i32 = arith.constant 1 : i32
    %0 = arith.muli %arg0, %c1_i32 : i32
    %1 = arith.addi %0, %arg1 : i32
    %c0_i32 = arith.constant 0 : i32
    %c0_i32_0 = arith.constant 0 : i32
    %c0_i32_1 = arith.constant 0 : i32
    return %1, %c0_i32, %c0_i32_0 : i32, i32, i32
  }
}

</mosaic_0001>

<bundles_post_ra>
// kernel: tpu_custom_call.1
= control target key start
LH: loop header
LB: loop body
LE: loop exit
PB: predicated region body
PF: predicated region fallthrough
CT: control target
= control target key end

     0   :  { %11 = vsyncpa [#allocation3], 0  ;;  %s514_s0 = inlined_call_operand.hbm [shape: f32[8,32], index: 0, kind: input, shape index: {}]   ;;  %s515_s1 = inlined_call_operand.vmem [shape: f32[1,32], index: 1, kind: input, shape index: {}]   ;;  %s516_s2 = inlined_call_operand.hbm [shape: f32[1,1,32], index: 2, kind: output, shape index: {0}]   ;;  %s517_s3 = inlined_call_operand.hbm [shape: f32[1,1,1], index: 3, kind: output, shape index: {1}]   ;;  %s518_s4 = inlined_call_operand.hbm [shape: f32[1,1,1], index: 4, kind: output, shape index: {2}]   ;;  %s519_s5 = inlined_call_operand.hbm [shape: f32[1,1,8], index: 5, kind: output, shape index: {3}]  }
   0x1   :  { %12 = vsyncpa [#allocation4], 0 }
   0x2   :  { %13 = vsyncpa [#allocation7], 0 }
   0x3   :  { %14 = vsyncpa [#allocation10], 0  ;;  %s448_s18 = smov [#allocation2]  }
   0x4   :  { %s26_s19 = sshll.u32 %s448_s18, 4  ;;  %s27_s19 = int_to_ptr.vmem [resolvable:$true] %s26_s19 }
   0x5   :  { %s348_s20 = scalar_lea.vmem %s27_s19, 128  ;;  %p353_p1 = scmp.lt.s32.totalorder %s27_s19, %s27_s19 }
   0x6   :  { %p349_p0 = scmp.ne.s32.totalorder %s27_s19, %s348_s20  ;;  %p354_p2 = scmp.lt.s32.totalorder %s348_s20, %s348_s20 }
   0x8   :  { %p355_p3 = por %p354_p2, %p353_p1 }
   0xa   :  { %p356_p4 = pnand %p355_p3, %p349_p0 }
   0xc   :  { %359 = shalt.err (!%p356_p4)
}
   0xd   :  { %29 = dma.hbm_to_vmem [thread:$0]  %s514_s0, 128, %s27_s19, [#allocation3]  }
   0xe   :  { %440 = dma.done.wait [#allocation3], 128  }
   0xf   :  { %441 = vsyncadd [#allocation3], 4294967168  ;;  %vm43_vm0 = vcmask 0   ;;  %v449_v0 = vmov -inf   ;;  %v450_v1 = vmov 0.0   ;;  %vm451_vm1 = vmmov 0  }
  0x10   :  { %44 = vst.msk [vmem:[#allocation6] sm:$0x1] %vm43_vm0, %v449_v0  ;;  %45 = vst.msk [vmem:[#allocation8] sm:$0x1] %vm43_vm0, %v450_v1  ;;  %315 = vmatprep.subr.mxu0 %v450_v1  ;;  %320 = vmatprep.subr.mxu1 %v450_v1  ;;  %vm50_vm2 = vcmask 261120   ;;  %v49_v2 = vld [vmem:[#allocation2] sm:$0xff]  ;;  %v142_v12 = vlaneseq }
  0x11   :  { %317 = vmatprep.mubr.msk.f32.mxu0 %vm451_vm1, %v450_v1  ;;  %322 = vmatprep.mubr.msk.f32.mxu1 %vm451_vm1, %v450_v1  ;;  %v48_v3 = vld [vmem:[%s515_s1] sm:$0x1]  ;;  %vm127_vm3 = vcmask 57344   ;;  %v452_v7 = vmov 0   ;;  %vm169_vm4 = vcmask 64512   ;;  %vm46_vm5 = vcmask 253952  }
  0x12   :  { %316 = vmatpush3.xpose.msk.msra.mxu0 %vm50_vm2, %v49_v2  ;;  %321 = vmatpush3.msra.mxu1 %v49_v2  ;;  %v143_v13 = vshrl.u32 %v142_v12, 7  ;;  %47 = vst.msk [vmem:[#allocation5] sm:$0x1] %vm46_vm5, %v450_v1  ;;  %s453_s0 = smov [#allocation6]  }
  0x13   :  { %334 = vset.pattern.permute.xlu0 %v452_v7  ;;  %335 = vset.pattern.permute.xlu1 %v452_v7  ;;  %s263_s1 = sshll.u32 %s453_s0, 4  ;;  %s264_s1 = int_to_ptr.vmem [resolvable:$true] %s263_s1 }
  0x14   :  { %v144_v14 = vsub.s32 0, %v143_v13  ;;  %s360_s25 = scalar_lea.vmem %s264_s1, 16  ;;  %s364_s26 = scalar_lea.vmem %s264_s1, 32 }
  0x15   :  { %318 = vmatmul.mubr.msk.f32.vlgmr.msra.gmra.mxu0 %vm50_vm2, %v48_v3  ;;  %p361_p5 = scmp.ne.s32.totalorder %s264_s1, %s360_s25  ;;  %p365_p6 = scmp.lt.s32.totalorder %s264_s1, %s264_s1 }
  0x16   :  { %p366_p7 = scmp.lt.s32.totalorder %s364_s26, %s360_s25 }
  0x17   :  { %v129_v8 = vld [vmem:[#allocation6] sm:$0x1] }
  0x18   :  { %p367_p8 = por %p366_p7, %p365_p6 }
  0x1a   :  { %p368_p9 = pnand %p367_p8, %p361_p5 }
  0xd5   :  { %v123_v4 = vpop.f32.mrf.mxu0 }
  0xd6   :  { %v130_v5 = vsel %vm127_vm3, %v123_v4, -inf  ;;  %128 = vst.msk [vmem:[#allocation9] sm:$0x1] %vm127_vm3, %v123_v4 }
  0xd7   :  { %131 = vmax.xlane.f32.xlu0 %v130_v5  ;;  %v319_v6 = vpop.f32.mrf.mxu0 }
 0x160   :  { %v132_v9 = vpop.xlane.xlu0 %131 }
 0x161   :  { %v133_v10 = vmax.f32 %v129_v8, %v132_v9 }
 0x163   :  { %v134_v11 = vsub.f32 %v129_v8, %v133_v10  ;;  %246 = vst.msk [vmem:[#allocation6] sm:$0x1] %vm43_vm0, %v133_v10  ;;  %139 = vperm.xlu0 %334, %v133_v10  }
 0x165   :  { %v135_v20 = vmul.f32 1.442695, %v134_v11 }
 0x1de   :  { %v140_v15 = vpop.permute.xlu0 %139 }
 0x1df   :  { %v145_v16 = vrot.slane %v140_v15, %v144_v14 }
 0x1e1   :  { %v146_v17 = vsub.f32 %v123_v4, %v145_v16 }
 0x1e3   :  { %v147_v18 = vmul.f32 1.442695, %v146_v17 }
 0x1e5   :  { %336 = vpow2.f32 %v147_v18 }
 0x1e6   :  { %338 = vpow2.f32 %v135_v20 }
 0x1f2   :  { %v337_v19 = vpop.eup %336 }
 0x1f3   :  { %323 = vmatmul.mubr.msk.f32.vlgmr.msra.gmra.mxu1 %vm169_vm4, %v337_v19  ;;  %v151_v21 = vsel %vm127_vm3, %v337_v19, 0.0  ;;  %v339_v22 = vpop.eup %338 }
 0x1f4   :  { %152 = vadd.xlane.f32.xlu1 %v151_v21 }
 0x205   :  { %160 = vperm.xlu1 %335, %v339_v22  }
 0x206   :  { %371 = shalt.err (!%p368_p9)
}
 0x207   :  { %266 = dma.vmem_to_hbm [thread:$0]  %s264_s1, 16, %s517_s3, [#allocation7]  }
 0x208   :  { %s454_s29 = smov [#allocation9]  }
 0x209   :  { %s286_s30 = sshll.u32 %s454_s29, 4  ;;  %s287_s30 = int_to_ptr.vmem [resolvable:$true] %s286_s30 }
 0x20a   :  { %s380_s6 = scalar_lea.vmem %s287_s30, 16  ;;  %s384_s7 = scalar_lea.vmem %s287_s30, 32 }
 0x20b   :  { %p381_p10 = scmp.ne.s32.totalorder %s287_s30, %s380_s6  ;;  %p385_p11 = scmp.lt.s32.totalorder %s287_s30, %s287_s30 }
 0x20c   :  { %p386_p12 = scmp.lt.s32.totalorder %s384_s7, %s380_s6 }
 0x20e   :  { %p387_p13 = por %p386_p12, %p385_p11 }
 0x210   :  { %p388_p0 = pnand %p387_p13, %p381_p10 }
 0x212   :  { %391 = shalt.err (!%p388_p0)
}
 0x213   :  { %289 = dma.vmem_to_hbm [thread:$0]  %s287_s30, 16, %s519_s5, [#allocation10]   ;;  %v149_v23 = vld [vmem:[#allocation8] sm:$0x1] }
 0x214   :  { %s455_s10 = smov [#allocation8]   ;;  %v150_v24 = vmul.f32 %v339_v22, %v149_v23 }
 0x215   :  { %s273_s11 = sshll.u32 %s455_s10, 4  ;;  %s274_s11 = int_to_ptr.vmem [resolvable:$true] %s273_s11 }
 0x216   :  { %s400_s3 = scalar_lea.vmem %s274_s11, 16  ;;  %s404_s12 = scalar_lea.vmem %s274_s11, 32 }
 0x217   :  { %p401_p1 = scmp.ne.s32.totalorder %s274_s11, %s400_s3  ;;  %p405_p2 = scmp.lt.s32.totalorder %s274_s11, %s274_s11 }
 0x218   :  { %p406_p3 = scmp.lt.s32.totalorder %s404_s12, %s400_s3 }
 0x21a   :  { %p407_p4 = por %p406_p3, %p405_p2 }
 0x21c   :  { %p408_p5 = pnand %p407_p4, %p401_p1 }
 0x27d   :  { %v153_v25 = vpop.xlane.xlu1 %152 }
 0x27e   :  { %v154_v26 = vadd.f32 %v153_v25, %v150_v24 }
 0x280   :  { %156 = vst.msk [vmem:[#allocation8] sm:$0x1] %vm43_vm0, %v154_v26 }
 0x281   :  { %411 = shalt.err (!%p408_p5)
}
 0x282   :  { %276 = dma.vmem_to_hbm [thread:$0]  %s274_s11, 16, %s518_s4, [#allocation7]   ;;  %v161_v27 = vpop.permute.xlu1 %160  ;;  %v157_v29 = vld [vmem:[#allocation5] sm:$0x1] }
 0x283   :  { %v166_v28 = vrot.slane %v161_v27, %v144_v14  ;;  %s456_s5 = smov [#allocation5]  }
 0x284   :  { %s253_s15 = sshll.u32 %s456_s5, 4  ;;  %s254_s15 = int_to_ptr.vmem [resolvable:$true] %s253_s15 }
 0x285   :  { %v167_v30 = vmul.f32 %v166_v28, %v157_v29  ;;  %s420_s16 = scalar_lea.vmem %s254_s15, 16  ;;  %s424_s17 = scalar_lea.vmem %s254_s15, 32 }
 0x286   :  { %p421_p6 = scmp.ne.s32.totalorder %s254_s15, %s420_s16  ;;  %p425_p7 = scmp.lt.s32.totalorder %s254_s15, %s254_s15 }
 0x287   :  { %p426_p8 = scmp.lt.s32.totalorder %s424_s17, %s420_s16 }
 0x289   :  { %p427_p9 = por %p426_p8, %p425_p7 }
 0x28b   :  { %p428_p10 = pnand %p427_p9, %p421_p6 }
 0x2b3   :  { %v239_v31 = vpop.f32.mrf.mxu1 }
 0x2b4   :  { %v243_v32 = vadd.f32 %v239_v31, %v167_v30 }
 0x2b5   :  { %v324_v33 = vpop.f32.mrf.mxu1 }
 0x2b6   :  { %245 = vst.msk [vmem:[#allocation5] sm:$0x1] %vm46_vm5, %v243_v32 }
 0x2b7   :  { %431 = shalt.err (!%p428_p10)
}
 0x2b8   :  { %256 = dma.vmem_to_hbm [thread:$0]  %s254_s15, 16, %s516_s2, [#allocation4]  }
 0x2b9   :  { %442 = dma.done.wait [#allocation4], 16  }
 0x2ba   :  { %443 = vsyncadd [#allocation4], 4294967280 }
 0x2bb   :  { %444 = dma.done.wait [#allocation7], 32  }
 0x2bc   :  { %445 = vsyncadd [#allocation7], 4294967264 }
 0x2bd   :  { %446 = dma.done.wait [#allocation10], 16  }
 0x2be   :  { %447 = vsyncadd [#allocation10], 4294967280 }
 0x2bf   :  { %302 = vsyncpa [#allocation3], 1 }
 0x2c0   :  { %303 = vsyncpa [#allocation4], 1 }
 0x2c1   :  { %304 = vsyncpa [#allocation7], 1 }
 0x2c2   :  { %305 = vsyncpa [#allocation10], 1 }

</bundles_post_ra>
